<compile_context>
chip_gen: v6e
topology: v6e:2x2x1
jax: 0.10.0
libtpu: 0.0.40
codegen_flags: <defaults>
</compile_context>

<pallas_src>
import jax
import jax.numpy as jnp
from jax.experimental import pallas as pl
from jax.experimental.pallas import tpu as pltpu


def _gate_kernel(g_ref, x_ref, wg_ref, wx_ref, b_ref, wp_ref, bp_ref, o_ref):
    # g_ref: (F_g, T)   x_ref: (F_l, T)   -- pixels on lanes, channels on sublanes
    # wg_ref: (F_int, F_g)  wx_ref: (F_int, F_l)  (SMEM, BN folded)
    # b_ref:  (F_int,)  combined bias (bg + bx)   wp_ref: (F_int,)   bp_ref: (1,)
    F_int, F_g = wg_ref.shape
    F_l = wx_ref.shape[1]
    T = g_ref.shape[-1]

    # Per-channel pixel rows, each (1, T); loads from VMEM are cheap.
    g_rows = [g_ref[pl.ds(c, 1), :].astype(jnp.float32) for c in range(F_g)]
    x_rows = [x_ref[pl.ds(c, 1), :].astype(jnp.float32) for c in range(F_l)]

    # psi pre-activation accumulated over the F_int hidden channels:
    #   psi = bp + sum_o wp[o] * relu( sum_c wg[o,c]*g[c] + sum_c wx[o,c]*x[c] + b[o] )
    # Pure VPU broadcast-MACs (scalar-from-SMEM * vector); no MXU.
    psi = jnp.full((1, T), bp_ref[0], dtype=jnp.float32)
    for o in range(F_int):
        acc = jnp.full((1, T), b_ref[o], dtype=jnp.float32)
        for c in range(F_g):
            acc = acc + wg_ref[o, c] * g_rows[c]
        for c in range(F_l):
            acc = acc + wx_ref[o, c] * x_rows[c]
        psi = psi + wp_ref[o] * jnp.maximum(acc, 0.0)          # ReLU then psi-MAC

    psi = jax.nn.sigmoid(psi)                                  # (1, T), EUP

    x_full = x_ref[...].astype(jnp.float32)                    # (F_l, T)
    o_ref[...] = (x_full * psi).astype(o_ref.dtype)            # lane-dense store


def _fold_bn(w, b, gamma, beta, mean, var, eps=1e-5):
    """Fold eval-mode BatchNorm into a 1x1 conv. w: (Cout, Cin), b: (Cout,)."""
    scale = gamma / jnp.sqrt(var + eps)
    w_f = w * scale[:, None]
    b_f = (b - mean) * scale + beta
    return w_f, b_f


def _round_up(a, m):
    return ((a + m - 1) // m) * m


def _pick_tile(tile_req, hw, f_g, f_l, itemsize):
    """Largest lane tile (multiple of 128) within a conservative VMEM budget."""
    tile = min(tile_req, _round_up(hw, 128))
    # Double-buffered g + x inputs and the output block; stay well below the
    # default scoped VMEM on every chip (v7x has only 64 MiB physical VMEM).
    budget = 24 * 1024 * 1024
    bytes_per_pixel = 2 * (f_g + 2 * f_l) * max(int(itemsize), 1)
    max_tile = max(128, (budget // bytes_per_pixel) // 128 * 128)
    tile = min(tile, max_tile)
    return max(128, (tile // 128) * 128)


def gate_forward(g, x, params, *, tile_hw=1024):
    """g: (N, F_g, H, W), x: (N, F_l, H, W)  ->  (N, F_l, H, W)  (NCHW in/out)."""
    N, F_g, H, W = g.shape
    _, F_l, _, _ = x.shape
    HW = H * W

    # Fold BN into the three 1x1 convs (f32 parameters for SMEM scalars).
    wg, bg = _fold_bn(params["wg_w"], params["wg_b"], params["wg_bn_g"],
                      params["wg_bn_b"], params["wg_bn_m"], params["wg_bn_v"])
    wx, bx = _fold_bn(params["wx_w"], params["wx_b"], params["wx_bn_g"],
                      params["wx_bn_b"], params["wx_bn_m"], params["wx_bn_v"])
    wp, bp = _fold_bn(params["psi_w"], params["psi_b"], params["psi_bn_g"],
                      params["psi_bn_b"], params["psi_bn_m"], params["psi_bn_v"])
    F_int = wg.shape[0]

    wg_s = wg.astype(jnp.float32)                      # (F_int, F_g)
    wx_s = wx.astype(jnp.float32)                      # (F_int, F_l)
    b_s = (bg + bx).astype(jnp.float32)                # (F_int,)
    wp_s = wp.reshape(F_int).astype(jnp.float32)       # (F_int,)
    bp_s = bp.reshape(1).astype(jnp.float32)           # (1,)

    # NCHW -> (N, C, HW): a free reshape, no relayout. Pixels go on lanes.
    g3 = g.reshape(N, F_g, HW)
    x3 = x.reshape(N, F_l, HW)

    tile = _pick_tile(tile_hw, HW, F_g, F_l, jnp.dtype(x.dtype).itemsize)
    HW_pad = _round_up(HW, tile)
    if HW_pad != HW:
        g3 = jnp.pad(g3, ((0, 0), (0, 0), (0, HW_pad - HW)))
        x3 = jnp.pad(x3, ((0, 0), (0, 0), (0, HW_pad - HW)))

    grid = (N, HW_pad // tile)
    smem_spec = pl.BlockSpec(memory_space=pltpu.MemorySpace.SMEM)

    out = pl.pallas_call(
        _gate_kernel,
        out_shape=jax.ShapeDtypeStruct((N, F_l, HW_pad), x.dtype),
        grid_spec=pltpu.PrefetchScalarGridSpec(
            num_scalar_prefetch=0,
            grid=grid,
            in_specs=[
                pl.BlockSpec((None, F_g, tile), lambda n, t: (n, 0, t)),  # g
                pl.BlockSpec((None, F_l, tile), lambda n, t: (n, 0, t)),  # x
                smem_spec,   # wg   (F_int, F_g)
                smem_spec,   # wx   (F_int, F_l)
                smem_spec,   # b    (F_int,)
                smem_spec,   # wp   (F_int,)
                smem_spec,   # bp   (1,)
            ],
            out_specs=pl.BlockSpec((None, F_l, tile), lambda n, t: (n, 0, t)),
        ),
        compiler_params=pltpu.CompilerParams(
            dimension_semantics=("parallel", "parallel"),
            vmem_limit_bytes=32 * 1024 * 1024),
    )(g3, x3, wg_s, wx_s, b_s, wp_s, bp_s)

    return out[:, :, :HW].reshape(N, F_l, H, W)


def gate_reference(g, x, params):
    """Pure-JAX reference (same math, no Pallas)."""
    wg, bg = _fold_bn(params["wg_w"], params["wg_b"], params["wg_bn_g"],
                      params["wg_bn_b"], params["wg_bn_m"], params["wg_bn_v"])
    wx, bx = _fold_bn(params["wx_w"], params["wx_b"], params["wx_bn_g"],
                      params["wx_bn_b"], params["wx_bn_m"], params["wx_bn_v"])
    wp, bp = _fold_bn(params["psi_w"], params["psi_b"], params["psi_bn_g"],
                      params["psi_bn_b"], params["psi_bn_m"], params["psi_bn_v"])
    g1 = jnp.einsum("nchw,oc->nohw", g, wg) + bg[None, :, None, None]
    x1 = jnp.einsum("nchw,oc->nohw", x, wx) + bx[None, :, None, None]
    h = jax.nn.relu(g1 + x1)
    psi = jax.nn.sigmoid(jnp.einsum("nchw,oc->nohw", h, wp)
                         + bp[None, :, None, None])
    return x * psi


def make_params(key, F_g, F_l, F_int):
    ks = jax.random.split(key, 12)
    return {
        # conv weights stored PyTorch-style (Cout, Cin) for 1x1 convs
        "wg_w": jax.random.normal(ks[0], (F_int, F_g), jnp.float32) * 0.2,
        "wg_b": jax.random.normal(ks[1], (F_int,), jnp.float32) * 0.1,
        "wx_w": jax.random.normal(ks[2], (F_int, F_l), jnp.float32) * 0.2,
        "wx_b": jax.random.normal(ks[3], (F_int,), jnp.float32) * 0.1,
        "psi_w": jax.random.normal(ks[4], (1, F_int), jnp.float32) * 0.2,
        "psi_b": jax.random.normal(ks[5], (1,), jnp.float32) * 0.1,
        # BatchNorm (eval-mode) parameters / running stats, deterministic
        "wg_bn_g": 1.0 + 0.1 * jax.random.normal(ks[6], (F_int,), jnp.float32),
        "wg_bn_b": 0.1 * jax.random.normal(ks[7], (F_int,), jnp.float32),
        "wg_bn_m": 0.05 * jnp.arange(F_int, dtype=jnp.float32),
        "wg_bn_v": jnp.ones((F_int,), jnp.float32),
        "wx_bn_g": 1.0 + 0.1 * jax.random.normal(ks[8], (F_int,), jnp.float32),
        "wx_bn_b": 0.1 * jax.random.normal(ks[9], (F_int,), jnp.float32),
        "wx_bn_m": -0.05 * jnp.arange(F_int, dtype=jnp.float32),
        "wx_bn_v": jnp.ones((F_int,), jnp.float32),
        "psi_bn_g": 1.0 + 0.1 * jax.random.normal(ks[10], (1,), jnp.float32),
        "psi_bn_b": 0.1 * jax.random.normal(ks[11], (1,), jnp.float32),
        "psi_bn_m": jnp.zeros((1,), jnp.float32),
        "psi_bn_v": jnp.ones((1,), jnp.float32),
    }


if __name__ == "__main__":
    # Small deterministic example: N=2, F_g=F_l=4, F_int=8, H=W=16.
    key = jax.random.PRNGKey(0)
    kg, kx, kp = jax.random.split(key, 3)
    N, F_g, F_l, F_int, H, W = 2, 4, 4, 8, 16, 16

    g = jax.random.normal(kg, (N, F_g, H, W), jnp.float32)
    x = jax.random.normal(kx, (N, F_l, H, W), jnp.float32)
    params = make_params(kp, F_g, F_l, F_int)

    out = jax.block_until_ready(gate_forward(g, x, params))
    ref = jax.block_until_ready(gate_reference(g, x, params))

    assert out.shape == (N, F_l, H, W)
    assert jnp.allclose(out, ref, atol=1e-5, rtol=1e-5), "mismatch vs reference"

    print("KERNEL_OK")
</pallas_src>

<mosaic_0001>
module attributes {stable_mosaic.version = 11 : i64} {
  func.func @_gate_kernel(%arg0: i32, %arg1: i32, %arg2: memref<1x4x256xf32, #tpu.memory_space<vmem>>, %arg3: memref<1x4x256xf32, #tpu.memory_space<vmem>>, %arg4: memref<8x4xf32, #tpu.memory_space<smem>>, %arg5: memref<8x4xf32, #tpu.memory_space<smem>>, %arg6: memref<8xf32, #tpu.memory_space<smem>>, %arg7: memref<8xf32, #tpu.memory_space<smem>>, %arg8: memref<1xf32, #tpu.memory_space<smem>>, %arg9: memref<1x4x256xf32, #tpu.memory_space<vmem>>) attributes {dimension_semantics = [#tpu.dimension_semantics<parallel>, #tpu.dimension_semantics<parallel>], iteration_bounds = array<i64: 2, 1>, scalar_prefetch = 0 : i64, scratch_operands = 0 : i64, tpu.core_type = #tpu.core_type<tc>, window_params = [{transform_indices = @transform_0, window_bounds = array<i64: 1, 4, 256>}, {transform_indices = @transform_1, window_bounds = array<i64: 1, 4, 256>}, {transform_indices = @transform_2, window_bounds = array<i64: 8, 4>}, {transform_indices = @transform_3, window_bounds = array<i64: 8, 4>}, {transform_indices = @transform_4, window_bounds = array<i64: 8>}, {transform_indices = @transform_5, window_bounds = array<i64: 8>}, {transform_indices = @transform_6, window_bounds = array<i64: 1>}, {transform_indices = @transform_7, window_bounds = array<i64: 1, 4, 256>}]} {
    %c0 = arith.constant 0 : index
    %c0_0 = arith.constant 0 : index
    %c0_1 = arith.constant 0 : index
    %0 = vector.load %arg2[%c0, %c0_0, %c0_1] : memref<1x4x256xf32, #tpu.memory_space<vmem>>, vector<1x1x256xf32>
    %1 = vector.shape_cast %0 : vector<1x1x256xf32> to vector<1x256xf32>
    %c0_2 = arith.constant 0 : index
    %c1 = arith.constant 1 : index
    %c0_3 = arith.constant 0 : index
    %2 = vector.load %arg2[%c0_2, %c1, %c0_3] : memref<1x4x256xf32, #tpu.memory_space<vmem>>, vector<1x1x256xf32>
    %3 = vector.shape_cast %2 : vector<1x1x256xf32> to vector<1x256xf32>
    %c0_4 = arith.constant 0 : index
    %c2 = arith.constant 2 : index
    %c0_5 = arith.constant 0 : index
    %4 = vector.load %arg2[%c0_4, %c2, %c0_5] : memref<1x4x256xf32, #tpu.memory_space<vmem>>, vector<1x1x256xf32>
    %5 = vector.shape_cast %4 : vector<1x1x256xf32> to vector<1x256xf32>
    %c0_6 = arith.constant 0 : index
    %c3 = arith.constant 3 : index
    %c0_7 = arith.constant 0 : index
    %6 = vector.load %arg2[%c0_6, %c3, %c0_7] : memref<1x4x256xf32, #tpu.memory_space<vmem>>, vector<1x1x256xf32>
    %7 = vector.shape_cast %6 : vector<1x1x256xf32> to vector<1x256xf32>
    %c0_8 = arith.constant 0 : index
    %c0_9 = arith.constant 0 : index
    %c0_10 = arith.constant 0 : index
    %8 = vector.load %arg3[%c0_8, %c0_9, %c0_10] : memref<1x4x256xf32, #tpu.memory_space<vmem>>, vector<1x1x256xf32>
    %9 = vector.shape_cast %8 : vector<1x1x256xf32> to vector<1x256xf32>
    %c0_11 = arith.constant 0 : index
    %c1_12 = arith.constant 1 : index
    %c0_13 = arith.constant 0 : index
    %10 = vector.load %arg3[%c0_11, %c1_12, %c0_13] : memref<1x4x256xf32, #tpu.memory_space<vmem>>, vector<1x1x256xf32>
    %11 = vector.shape_cast %10 : vector<1x1x256xf32> to vector<1x256xf32>
    %c0_14 = arith.constant 0 : index
    %c2_15 = arith.constant 2 : index
    %c0_16 = arith.constant 0 : index
    %12 = vector.load %arg3[%c0_14, %c2_15, %c0_16] : memref<1x4x256xf32, #tpu.memory_space<vmem>>, vector<1x1x256xf32>
    %13 = vector.shape_cast %12 : vector<1x1x256xf32> to vector<1x256xf32>
    %c0_17 = arith.constant 0 : index
    %c3_18 = arith.constant 3 : index
    %c0_19 = arith.constant 0 : index
    %14 = vector.load %arg3[%c0_17, %c3_18, %c0_19] : memref<1x4x256xf32, #tpu.memory_space<vmem>>, vector<1x1x256xf32>
    %15 = vector.shape_cast %14 : vector<1x1x256xf32> to vector<1x256xf32>
    %c0_20 = arith.constant 0 : index
    %16 = memref.load %arg8[%c0_20] : memref<1xf32, #tpu.memory_space<smem>>
    %17 = vector.broadcast %16 : f32 to vector<1x256xf32>
    %c0_21 = arith.constant 0 : index
    %18 = memref.load %arg6[%c0_21] : memref<8xf32, #tpu.memory_space<smem>>
    %19 = vector.broadcast %18 : f32 to vector<1x256xf32>
    %c0_22 = arith.constant 0 : index
    %c0_23 = arith.constant 0 : index
    %20 = memref.load %arg4[%c0_22, %c0_23] : memref<8x4xf32, #tpu.memory_space<smem>>
    %21 = vector.broadcast %20 : f32 to vector<1x256xf32>
    %22 = arith.mulf %21, %1 : vector<1x256xf32>
    %23 = arith.addf %19, %22 : vector<1x256xf32>
    %c0_24 = arith.constant 0 : index
    %c1_25 = arith.constant 1 : index
    %24 = memref.load %arg4[%c0_24, %c1_25] : memref<8x4xf32, #tpu.memory_space<smem>>
    %25 = vector.broadcast %24 : f32 to vector<1x256xf32>
    %26 = arith.mulf %25, %3 : vector<1x256xf32>
    %27 = arith.addf %23, %26 : vector<1x256xf32>
    %c0_26 = arith.constant 0 : index
    %c2_27 = arith.constant 2 : index
    %28 = memref.load %arg4[%c0_26, %c2_27] : memref<8x4xf32, #tpu.memory_space<smem>>
    %29 = vector.broadcast %28 : f32 to vector<1x256xf32>
    %30 = arith.mulf %29, %5 : vector<1x256xf32>
    %31 = arith.addf %27, %30 : vector<1x256xf32>
    %c0_28 = arith.constant 0 : index
    %c3_29 = arith.constant 3 : index
    %32 = memref.load %arg4[%c0_28, %c3_29] : memref<8x4xf32, #tpu.memory_space<smem>>
    %33 = vector.broadcast %32 : f32 to vector<1x256xf32>
    %34 = arith.mulf %33, %7 : vector<1x256xf32>
    %35 = arith.addf %31, %34 : vector<1x256xf32>
    %c0_30 = arith.constant 0 : index
    %c0_31 = arith.constant 0 : index
    %36 = memref.load %arg5[%c0_30, %c0_31] : memref<8x4xf32, #tpu.memory_space<smem>>
    %37 = vector.broadcast %36 : f32 to vector<1x256xf32>
    %38 = arith.mulf %37, %9 : vector<1x256xf32>
    %39 = arith.addf %35, %38 : vector<1x256xf32>
    %c0_32 = arith.constant 0 : index
    %c1_33 = arith.constant 1 : index
    %40 = memref.load %arg5[%c0_32, %c1_33] : memref<8x4xf32, #tpu.memory_space<smem>>
    %41 = vector.broadcast %40 : f32 to vector<1x256xf32>
    %42 = arith.mulf %41, %11 : vector<1x256xf32>
    %43 = arith.addf %39, %42 : vector<1x256xf32>
    %c0_34 = arith.constant 0 : index
    %c2_35 = arith.constant 2 : index
    %44 = memref.load %arg5[%c0_34, %c2_35] : memref<8x4xf32, #tpu.memory_space<smem>>
    %45 = vector.broadcast %44 : f32 to vector<1x256xf32>
    %46 = arith.mulf %45, %13 : vector<1x256xf32>
    %47 = arith.addf %43, %46 : vector<1x256xf32>
    %c0_36 = arith.constant 0 : index
    %c3_37 = arith.constant 3 : index
    %48 = memref.load %arg5[%c0_36, %c3_37] : memref<8x4xf32, #tpu.memory_space<smem>>
    %49 = vector.broadcast %48 : f32 to vector<1x256xf32>
    %50 = arith.mulf %49, %15 : vector<1x256xf32>
    %51 = arith.addf %47, %50 : vector<1x256xf32>
    %c0_38 = arith.constant 0 : index
    %52 = memref.load %arg7[%c0_38] : memref<8xf32, #tpu.memory_space<smem>>
    %cst = arith.constant 0.000000e+00 : f32
    %53 = vector.broadcast %cst : f32 to vector<1x256xf32>
    %54 = arith.maximumf %51, %53 : vector<1x256xf32>
    %55 = vector.broadcast %52 : f32 to vector<1x256xf32>
    %56 = arith.mulf %55, %54 : vector<1x256xf32>
    %57 = arith.addf %17, %56 : vector<1x256xf32>
    %c1_39 = arith.constant 1 : index
    %58 = memref.load %arg6[%c1_39] : memref<8xf32, #tpu.memory_space<smem>>
    %59 = vector.broadcast %58 : f32 to vector<1x256xf32>
    %c1_40 = arith.constant 1 : index
    %c0_41 = arith.constant 0 : index
    %60 = memref.load %arg4[%c1_40, %c0_41] : memref<8x4xf32, #tpu.memory_space<smem>>
    %61 = vector.broadcast %60 : f32 to vector<1x256xf32>
    %62 = arith.mulf %61, %1 : vector<1x256xf32>
    %63 = arith.addf %59, %62 : vector<1x256xf32>
    %c1_42 = arith.constant 1 : index
    %c1_43 = arith.constant 1 : index
    %64 = memref.load %arg4[%c1_42, %c1_43] : memref<8x4xf32, #tpu.memory_space<smem>>
    %65 = vector.broadcast %64 : f32 to vector<1x256xf32>
    %66 = arith.mulf %65, %3 : vector<1x256xf32>
    %67 = arith.addf %63, %66 : vector<1x256xf32>
    %c1_44 = arith.constant 1 : index
    %c2_45 = arith.constant 2 : index
    %68 = memref.load %arg4[%c1_44, %c2_45] : memref<8x4xf32, #tpu.memory_space<smem>>
    %69 = vector.broadcast %68 : f32 to vector<1x256xf32>
    %70 = arith.mulf %69, %5 : vector<1x256xf32>
    %71 = arith.addf %67, %70 : vector<1x256xf32>
    %c1_46 = arith.constant 1 : index
    %c3_47 = arith.constant 3 : index
    %72 = memref.load %arg4[%c1_46, %c3_47] : memref<8x4xf32, #tpu.memory_space<smem>>
    %73 = vector.broadcast %72 : f32 to vector<1x256xf32>
    %74 = arith.mulf %73, %7 : vector<1x256xf32>
    %75 = arith.addf %71, %74 : vector<1x256xf32>
    %c1_48 = arith.constant 1 : index
    %c0_49 = arith.constant 0 : index
    %76 = memref.load %arg5[%c1_48, %c0_49] : memref<8x4xf32, #tpu.memory_space<smem>>
    %77 = vector.broadcast %76 : f32 to vector<1x256xf32>
    %78 = arith.mulf %77, %9 : vector<1x256xf32>
    %79 = arith.addf %75, %78 : vector<1x256xf32>
    %c1_50 = arith.constant 1 : index
    %c1_51 = arith.constant 1 : index
    %80 = memref.load %arg5[%c1_50, %c1_51] : memref<8x4xf32, #tpu.memory_space<smem>>
    %81 = vector.broadcast %80 : f32 to vector<1x256xf32>
    %82 = arith.mulf %81, %11 : vector<1x256xf32>
    %83 = arith.addf %79, %82 : vector<1x256xf32>
    %c1_52 = arith.constant 1 : index
    %c2_53 = arith.constant 2 : index
    %84 = memref.load %arg5[%c1_52, %c2_53] : memref<8x4xf32, #tpu.memory_space<smem>>
    %85 = vector.broadcast %84 : f32 to vector<1x256xf32>
    %86 = arith.mulf %85, %13 : vector<1x256xf32>
    %87 = arith.addf %83, %86 : vector<1x256xf32>
    %c1_54 = arith.constant 1 : index
    %c3_55 = arith.constant 3 : index
    %88 = memref.load %arg5[%c1_54, %c3_55] : memref<8x4xf32, #tpu.memory_space<smem>>
    %89 = vector.broadcast %88 : f32 to vector<1x256xf32>
    %90 = arith.mulf %89, %15 : vector<1x256xf32>
    %91 = arith.addf %87, %90 : vector<1x256xf32>
    %c1_56 = arith.constant 1 : index
    %92 = memref.load %arg7[%c1_56] : memref<8xf32, #tpu.memory_space<smem>>
    %cst_57 = arith.constant 0.000000e+00 : f32
    %93 = vector.broadcast %cst_57 : f32 to vector<1x256xf32>
    %94 = arith.maximumf %91, %93 : vector<1x256xf32>
    %95 = vector.broadcast %92 : f32 to vector<1x256xf32>
    %96 = arith.mulf %95, %94 : vector<1x256xf32>
    %97 = arith.addf %57, %96 : vector<1x256xf32>
    %c2_58 = arith.constant 2 : index
    %98 = memref.load %arg6[%c2_58] : memref<8xf32, #tpu.memory_space<smem>>
    %99 = vector.broadcast %98 : f32 to vector<1x256xf32>
    %c2_59 = arith.constant 2 : index
    %c0_60 = arith.constant 0 : index
    %100 = memref.load %arg4[%c2_59, %c0_60] : memref<8x4xf32, #tpu.memory_space<smem>>
    %101 = vector.broadcast %100 : f32 to vector<1x256xf32>
    %102 = arith.mulf %101, %1 : vector<1x256xf32>
    %103 = arith.addf %99, %102 : vector<1x256xf32>
    %c2_61 = arith.constant 2 : index
    %c1_62 = arith.constant 1 : index
    %104 = memref.load %arg4[%c2_61, %c1_62] : memref<8x4xf32, #tpu.memory_space<smem>>
    %105 = vector.broadcast %104 : f32 to vector<1x256xf32>
    %106 = arith.mulf %105, %3 : vector<1x256xf32>
    %107 = arith.addf %103, %106 : vector<1x256xf32>
    %c2_63 = arith.constant 2 : index
    %c2_64 = arith.constant 2 : index
    %108 = memref.load %arg4[%c2_63, %c2_64] : memref<8x4xf32, #tpu.memory_space<smem>>
    %109 = vector.broadcast %108 : f32 to vector<1x256xf32>
    %110 = arith.mulf %109, %5 : vector<1x256xf32>
    %111 = arith.addf %107, %110 : vector<1x256xf32>
    %c2_65 = arith.constant 2 : index
    %c3_66 = arith.constant 3 : index
    %112 = memref.load %arg4[%c2_65, %c3_66] : memref<8x4xf32, #tpu.memory_space<smem>>
    %113 = vector.broadcast %112 : f32 to vector<1x256xf32>
    %114 = arith.mulf %113, %7 : vector<1x256xf32>
    %115 = arith.addf %111, %114 : vector<1x256xf32>
    %c2_67 = arith.constant 2 : index
    %c0_68 = arith.constant 0 : index
    %116 = memref.load %arg5[%c2_67, %c0_68] : memref<8x4xf32, #tpu.memory_space<smem>>
    %117 = vector.broadcast %116 : f32 to vector<1x256xf32>
    %118 = arith.mulf %117, %9 : vector<1x256xf32>
    %119 = arith.addf %115, %118 : vector<1x256xf32>
    %c2_69 = arith.constant 2 : index
    %c1_70 = arith.constant 1 : index
    %120 = memref.load %arg5[%c2_69, %c1_70] : memref<8x4xf32, #tpu.memory_space<smem>>
    %121 = vector.broadcast %120 : f32 to vector<1x256xf32>
    %122 = arith.mulf %121, %11 : vector<1x256xf32>
    %123 = arith.addf %119, %122 : vector<1x256xf32>
    %c2_71 = arith.constant 2 : index
    %c2_72 = arith.constant 2 : index
    %124 = memref.load %arg5[%c2_71, %c2_72] : memref<8x4xf32, #tpu.memory_space<smem>>
    %125 = vector.broadcast %124 : f32 to vector<1x256xf32>
    %126 = arith.mulf %125, %13 : vector<1x256xf32>
    %127 = arith.addf %123, %126 : vector<1x256xf32>
    %c2_73 = arith.constant 2 : index
    %c3_74 = arith.constant 3 : index
    %128 = memref.load %arg5[%c2_73, %c3_74] : memref<8x4xf32, #tpu.memory_space<smem>>
    %129 = vector.broadcast %128 : f32 to vector<1x256xf32>
    %130 = arith.mulf %129, %15 : vector<1x256xf32>
    %131 = arith.addf %127, %130 : vector<1x256xf32>
    %c2_75 = arith.constant 2 : index
    %132 = memref.load %arg7[%c2_75] : memref<8xf32, #tpu.memory_space<smem>>
    %cst_76 = arith.constant 0.000000e+00 : f32
    %133 = vector.broadcast %cst_76 : f32 to vector<1x256xf32>
    %134 = arith.maximumf %131, %133 : vector<1x256xf32>
    %135 = vector.broadcast %132 : f32 to vector<1x256xf32>
    %136 = arith.mulf %135, %134 : vector<1x256xf32>
    %137 = arith.addf %97, %136 : vector<1x256xf32>
    %c3_77 = arith.constant 3 : index
    %138 = memref.load %arg6[%c3_77] : memref<8xf32, #tpu.memory_space<smem>>
    %139 = vector.broadcast %138 : f32 to vector<1x256xf32>
    %c3_78 = arith.constant 3 : index
    %c0_79 = arith.constant 0 : index
    %140 = memref.load %arg4[%c3_78, %c0_79] : memref<8x4xf32, #tpu.memory_space<smem>>
    %141 = vector.broadcast %140 : f32 to vector<1x256xf32>
    %142 = arith.mulf %141, %1 : vector<1x256xf32>
    %143 = arith.addf %139, %142 : vector<1x256xf32>
    %c3_80 = arith.constant 3 : index
    %c1_81 = arith.constant 1 : index
    %144 = memref.load %arg4[%c3_80, %c1_81] : memref<8x4xf32, #tpu.memory_space<smem>>
    %145 = vector.broadcast %144 : f32 to vector<1x256xf32>
    %146 = arith.mulf %145, %3 : vector<1x256xf32>
    %147 = arith.addf %143, %146 : vector<1x256xf32>
    %c3_82 = arith.constant 3 : index
    %c2_83 = arith.constant 2 : index
    %148 = memref.load %arg4[%c3_82, %c2_83] : memref<8x4xf32, #tpu.memory_space<smem>>
    %149 = vector.broadcast %148 : f32 to vector<1x256xf32>
    %150 = arith.mulf %149, %5 : vector<1x256xf32>
    %151 = arith.addf %147, %150 : vector<1x256xf32>
    %c3_84 = arith.constant 3 : index
    %c3_85 = arith.constant 3 : index
    %152 = memref.load %arg4[%c3_84, %c3_85] : memref<8x4xf32, #tpu.memory_space<smem>>
    %153 = vector.broadcast %152 : f32 to vector<1x256xf32>
    %154 = arith.mulf %153, %7 : vector<1x256xf32>
    %155 = arith.addf %151, %154 : vector<1x256xf32>
    %c3_86 = arith.constant 3 : index
    %c0_87 = arith.constant 0 : index
    %156 = memref.load %arg5[%c3_86, %c0_87] : memref<8x4xf32, #tpu.memory_space<smem>>
    %157 = vector.broadcast %156 : f32 to vector<1x256xf32>
    %158 = arith.mulf %157, %9 : vector<1x256xf32>
    %159 = arith.addf %155, %158 : vector<1x256xf32>
    %c3_88 = arith.constant 3 : index
    %c1_89 = arith.constant 1 : index
    %160 = memref.load %arg5[%c3_88, %c1_89] : memref<8x4xf32, #tpu.memory_space<smem>>
    %161 = vector.broadcast %160 : f32 to vector<1x256xf32>
    %162 = arith.mulf %161, %11 : vector<1x256xf32>
    %163 = arith.addf %159, %162 : vector<1x256xf32>
    %c3_90 = arith.constant 3 : index
    %c2_91 = arith.constant 2 : index
    %164 = memref.load %arg5[%c3_90, %c2_91] : memref<8x4xf32, #tpu.memory_space<smem>>
    %165 = vector.broadcast %164 : f32 to vector<1x256xf32>
    %166 = arith.mulf %165, %13 : vector<1x256xf32>
    %167 = arith.addf %163, %166 : vector<1x256xf32>
    %c3_92 = arith.constant 3 : index
    %c3_93 = arith.constant 3 : index
    %168 = memref.load %arg5[%c3_92, %c3_93] : memref<8x4xf32, #tpu.memory_space<smem>>
    %169 = vector.broadcast %168 : f32 to vector<1x256xf32>
    %170 = arith.mulf %169, %15 : vector<1x256xf32>
    %171 = arith.addf %167, %170 : vector<1x256xf32>
    %c3_94 = arith.constant 3 : index
    %172 = memref.load %arg7[%c3_94] : memref<8xf32, #tpu.memory_space<smem>>
    %cst_95 = arith.constant 0.000000e+00 : f32
    %173 = vector.broadcast %cst_95 : f32 to vector<1x256xf32>
    %174 = arith.maximumf %171, %173 : vector<1x256xf32>
    %175 = vector.broadcast %172 : f32 to vector<1x256xf32>
    %176 = arith.mulf %175, %174 : vector<1x256xf32>
    %177 = arith.addf %137, %176 : vector<1x256xf32>
    %c4 = arith.constant 4 : index
    %178 = memref.load %arg6[%c4] : memref<8xf32, #tpu.memory_space<smem>>
    %179 = vector.broadcast %178 : f32 to vector<1x256xf32>
    %c4_96 = arith.constant 4 : index
    %c0_97 = arith.constant 0 : index
    %180 = memref.load %arg4[%c4_96, %c0_97] : memref<8x4xf32, #tpu.memory_space<smem>>
    %181 = vector.broadcast %180 : f32 to vector<1x256xf32>
    %182 = arith.mulf %181, %1 : vector<1x256xf32>
    %183 = arith.addf %179, %182 : vector<1x256xf32>
    %c4_98 = arith.constant 4 : index
    %c1_99 = arith.constant 1 : index
    %184 = memref.load %arg4[%c4_98, %c1_99] : memref<8x4xf32, #tpu.memory_space<smem>>
    %185 = vector.broadcast %184 : f32 to vector<1x256xf32>
    %186 = arith.mulf %185, %3 : vector<1x256xf32>
    %187 = arith.addf %183, %186 : vector<1x256xf32>
    %c4_100 = arith.constant 4 : index
    %c2_101 = arith.constant 2 : index
    %188 = memref.load %arg4[%c4_100, %c2_101] : memref<8x4xf32, #tpu.memory_space<smem>>
    %189 = vector.broadcast %188 : f32 to vector<1x256xf32>
    %190 = arith.mulf %189, %5 : vector<1x256xf32>
    %191 = arith.addf %187, %190 : vector<1x256xf32>
    %c4_102 = arith.constant 4 : index
    %c3_103 = arith.constant 3 : index
    %192 = memref.load %arg4[%c4_102, %c3_103] : memref<8x4xf32, #tpu.memory_space<smem>>
    %193 = vector.broadcast %192 : f32 to vector<1x256xf32>
    %194 = arith.mulf %193, %7 : vector<1x256xf32>
    %195 = arith.addf %191, %194 : vector<1x256xf32>
    %c4_104 = arith.constant 4 : index
    %c0_105 = arith.constant 0 : index
    %196 = memref.load %arg5[%c4_104, %c0_105] : memref<8x4xf32, #tpu.memory_space<smem>>
    %197 = vector.broadcast %196 : f32 to vector<1x256xf32>
    %198 = arith.mulf %197, %9 : vector<1x256xf32>
    %199 = arith.addf %195, %198 : vector<1x256xf32>
    %c4_106 = arith.constant 4 : index
    %c1_107 = arith.constant 1 : index
    %200 = memref.load %arg5[%c4_106, %c1_107] : memref<8x4xf32, #tpu.memory_space<smem>>
    %201 = vector.broadcast %200 : f32 to vector<1x256xf32>
    %202 = arith.mulf %201, %11 : vector<1x256xf32>
    %203 = arith.addf %199, %202 : vector<1x256xf32>
    %c4_108 = arith.constant 4 : index
    %c2_109 = arith.constant 2 : index
    %204 = memref.load %arg5[%c4_108, %c2_109] : memref<8x4xf32, #tpu.memory_space<smem>>
    %205 = vector.broadcast %204 : f32 to vector<1x256xf32>
    %206 = arith.mulf %205, %13 : vector<1x256xf32>
    %207 = arith.addf %203, %206 : vector<1x256xf32>
    %c4_110 = arith.constant 4 : index
    %c3_111 = arith.constant 3 : index
    %208 = memref.load %arg5[%c4_110, %c3_111] : memref<8x4xf32, #tpu.memory_space<smem>>
    %209 = vector.broadcast %208 : f32 to vector<1x256xf32>
    %210 = arith.mulf %209, %15 : vector<1x256xf32>
    %211 = arith.addf %207, %210 : vector<1x256xf32>
    %c4_112 = arith.constant 4 : index
    %212 = memref.load %arg7[%c4_112] : memref<8xf32, #tpu.memory_space<smem>>
    %cst_113 = arith.constant 0.000000e+00 : f32
    %213 = vector.broadcast %cst_113 : f32 to vector<1x256xf32>
    %214 = arith.maximumf %211, %213 : vector<1x256xf32>
    %215 = vector.broadcast %212 : f32 to vector<1x256xf32>
    %216 = arith.mulf %215, %214 : vector<1x256xf32>
    %217 = arith.addf %177, %216 : vector<1x256xf32>
    %c5 = arith.constant 5 : index
    %218 = memref.load %arg6[%c5] : memref<8xf32, #tpu.memory_space<smem>>
    %219 = vector.broadcast %218 : f32 to vector<1x256xf32>
    %c5_114 = arith.constant 5 : index
    %c0_115 = arith.constant 0 : index
    %220 = memref.load %arg4[%c5_114, %c0_115] : memref<8x4xf32, #tpu.memory_space<smem>>
    %221 = vector.broadcast %220 : f32 to vector<1x256xf32>
    %222 = arith.mulf %221, %1 : vector<1x256xf32>
    %223 = arith.addf %219, %222 : vector<1x256xf32>
    %c5_116 = arith.constant 5 : index
    %c1_117 = arith.constant 1 : index
    %224 = memref.load %arg4[%c5_116, %c1_117] : memref<8x4xf32, #tpu.memory_space<smem>>
    %225 = vector.broadcast %224 : f32 to vector<1x256xf32>
    %226 = arith.mulf %225, %3 : vector<1x256xf32>
    %227 = arith.addf %223, %226 : vector<1x256xf32>
    %c5_118 = arith.constant 5 : index
    %c2_119 = arith.constant 2 : index
    %228 = memref.load %arg4[%c5_118, %c2_119] : memref<8x4xf32, #tpu.memory_space<smem>>
    %229 = vector.broadcast %228 : f32 to vector<1x256xf32>
    %230 = arith.mulf %229, %5 : vector<1x256xf32>
    %231 = arith.addf %227, %230 : vector<1x256xf32>
    %c5_120 = arith.constant 5 : index
    %c3_121 = arith.constant 3 : index
    %232 = memref.load %arg4[%c5_120, %c3_121] : memref<8x4xf32, #tpu.memory_space<smem>>
    %233 = vector.broadcast %232 : f32 to vector<1x256xf32>
    %234 = arith.mulf %233, %7 : vector<1x256xf32>
    %235 = arith.addf %231, %234 : vector<1x256xf32>
    %c5_122 = arith.constant 5 : index
    %c0_123 = arith.constant 0 : index
    %236 = memref.load %arg5[%c5_122, %c0_123] : memref<8x4xf32, #tpu.memory_space<smem>>
    %237 = vector.broadcast %236 : f32 to vector<1x256xf32>
    %238 = arith.mulf %237, %9 : vector<1x256xf32>
    %239 = arith.addf %235, %238 : vector<1x256xf32>
    %c5_124 = arith.constant 5 : index
    %c1_125 = arith.constant 1 : index
    %240 = memref.load %arg5[%c5_124, %c1_125] : memref<8x4xf32, #tpu.memory_space<smem>>
    %241 = vector.broadcast %240 : f32 to vector<1x256xf32>
    %242 = arith.mulf %241, %11 : vector<1x256xf32>
    %243 = arith.addf %239, %242 : vector<1x256xf32>
    %c5_126 = arith.constant 5 : index
    %c2_127 = arith.constant 2 : index
    %244 = memref.load %arg5[%c5_126, %c2_127] : memref<8x4xf32, #tpu.memory_space<smem>>
    %245 = vector.broadcast %244 : f32 to vector<1x256xf32>
    %246 = arith.mulf %245, %13 : vector<1x256xf32>
    %247 = arith.addf %243, %246 : vector<1x256xf32>
    %c5_128 = arith.constant 5 : index
    %c3_129 = arith.constant 3 : index
    %248 = memref.load %arg5[%c5_128, %c3_129] : memref<8x4xf32, #tpu.memory_space<smem>>
    %249 = vector.broadcast %248 : f32 to vector<1x256xf32>
    %250 = arith.mulf %249, %15 : vector<1x256xf32>
    %251 = arith.addf %247, %250 : vector<1x256xf32>
    %c5_130 = arith.constant 5 : index
    %252 = memref.load %arg7[%c5_130] : memref<8xf32, #tpu.memory_space<smem>>
    %cst_131 = arith.constant 0.000000e+00 : f32
    %253 = vector.broadcast %cst_131 : f32 to vector<1x256xf32>
    %254 = arith.maximumf %251, %253 : vector<1x256xf32>
    %255 = vector.broadcast %252 : f32 to vector<1x256xf32>
    %256 = arith.mulf %255, %254 : vector<1x256xf32>
    %257 = arith.addf %217, %256 : vector<1x256xf32>
    %c6 = arith.constant 6 : index
    %258 = memref.load %arg6[%c6] : memref<8xf32, #tpu.memory_space<smem>>
    %259 = vector.broadcast %258 : f32 to vector<1x256xf32>
    %c6_132 = arith.constant 6 : index
    %c0_133 = arith.constant 0 : index
    %260 = memref.load %arg4[%c6_132, %c0_133] : memref<8x4xf32, #tpu.memory_space<smem>>
    %261 = vector.broadcast %260 : f32 to vector<1x256xf32>
    %262 = arith.mulf %261, %1 : vector<1x256xf32>
    %263 = arith.addf %259, %262 : vector<1x256xf32>
    %c6_134 = arith.constant 6 : index
    %c1_135 = arith.constant 1 : index
    %264 = memref.load %arg4[%c6_134, %c1_135] : memref<8x4xf32, #tpu.memory_space<smem>>
    %265 = vector.broadcast %264 : f32 to vector<1x256xf32>
    %266 = arith.mulf %265, %3 : vector<1x256xf32>
    %267 = arith.addf %263, %266 : vector<1x256xf32>
    %c6_136 = arith.constant 6 : index
    %c2_137 = arith.constant 2 : index
    %268 = memref.load %arg4[%c6_136, %c2_137] : memref<8x4xf32, #tpu.memory_space<smem>>
    %269 = vector.broadcast %268 : f32 to vector<1x256xf32>
    %270 = arith.mulf %269, %5 : vector<1x256xf32>
    %271 = arith.addf %267, %270 : vector<1x256xf32>
    %c6_138 = arith.constant 6 : index
    %c3_139 = arith.constant 3 : index
    %272 = memref.load %arg4[%c6_138, %c3_139] : memref<8x4xf32, #tpu.memory_space<smem>>
    %273 = vector.broadcast %272 : f32 to vector<1x256xf32>
    %274 = arith.mulf %273, %7 : vector<1x256xf32>
    %275 = arith.addf %271, %274 : vector<1x256xf32>
    %c6_140 = arith.constant 6 : index
    %c0_141 = arith.constant 0 : index
    %276 = memref.load %arg5[%c6_140, %c0_141] : memref<8x4xf32, #tpu.memory_space<smem>>
    %277 = vector.broadcast %276 : f32 to vector<1x256xf32>
    %278 = arith.mulf %277, %9 : vector<1x256xf32>
    %279 = arith.addf %275, %278 : vector<1x256xf32>
    %c6_142 = arith.constant 6 : index
    %c1_143 = arith.constant 1 : index
    %280 = memref.load %arg5[%c6_142, %c1_143] : memref<8x4xf32, #tpu.memory_space<smem>>
    %281 = vector.broadcast %280 : f32 to vector<1x256xf32>
    %282 = arith.mulf %281, %11 : vector<1x256xf32>
    %283 = arith.addf %279, %282 : vector<1x256xf32>
    %c6_144 = arith.constant 6 : index
    %c2_145 = arith.constant 2 : index
    %284 = memref.load %arg5[%c6_144, %c2_145] : memref<8x4xf32, #tpu.memory_space<smem>>
    %285 = vector.broadcast %284 : f32 to vector<1x256xf32>
    %286 = arith.mulf %285, %13 : vector<1x256xf32>
    %287 = arith.addf %283, %286 : vector<1x256xf32>
    %c6_146 = arith.constant 6 : index
    %c3_147 = arith.constant 3 : index
    %288 = memref.load %arg5[%c6_146, %c3_147] : memref<8x4xf32, #tpu.memory_space<smem>>
    %289 = vector.broadcast %288 : f32 to vector<1x256xf32>
    %290 = arith.mulf %289, %15 : vector<1x256xf32>
    %291 = arith.addf %287, %290 : vector<1x256xf32>
    %c6_148 = arith.constant 6 : index
    %292 = memref.load %arg7[%c6_148] : memref<8xf32, #tpu.memory_space<smem>>
    %cst_149 = arith.constant 0.000000e+00 : f32
    %293 = vector.broadcast %cst_149 : f32 to vector<1x256xf32>
    %294 = arith.maximumf %291, %293 : vector<1x256xf32>
    %295 = vector.broadcast %292 : f32 to vector<1x256xf32>
    %296 = arith.mulf %295, %294 : vector<1x256xf32>
    %297 = arith.addf %257, %296 : vector<1x256xf32>
    %c7 = arith.constant 7 : index
    %298 = memref.load %arg6[%c7] : memref<8xf32, #tpu.memory_space<smem>>
    %299 = vector.broadcast %298 : f32 to vector<1x256xf32>
    %c7_150 = arith.constant 7 : index
    %c0_151 = arith.constant 0 : index
    %300 = memref.load %arg4[%c7_150, %c0_151] : memref<8x4xf32, #tpu.memory_space<smem>>
    %301 = vector.broadcast %300 : f32 to vector<1x256xf32>
    %302 = arith.mulf %301, %1 : vector<1x256xf32>
    %303 = arith.addf %299, %302 : vector<1x256xf32>
    %c7_152 = arith.constant 7 : index
    %c1_153 = arith.constant 1 : index
    %304 = memref.load %arg4[%c7_152, %c1_153] : memref<8x4xf32, #tpu.memory_space<smem>>
    %305 = vector.broadcast %304 : f32 to vector<1x256xf32>
    %306 = arith.mulf %305, %3 : vector<1x256xf32>
    %307 = arith.addf %303, %306 : vector<1x256xf32>
    %c7_154 = arith.constant 7 : index
    %c2_155 = arith.constant 2 : index
    %308 = memref.load %arg4[%c7_154, %c2_155] : memref<8x4xf32, #tpu.memory_space<smem>>
    %309 = vector.broadcast %308 : f32 to vector<1x256xf32>
    %310 = arith.mulf %309, %5 : vector<1x256xf32>
    %311 = arith.addf %307, %310 : vector<1x256xf32>
    %c7_156 = arith.constant 7 : index
    %c3_157 = arith.constant 3 : index
    %312 = memref.load %arg4[%c7_156, %c3_157] : memref<8x4xf32, #tpu.memory_space<smem>>
    %313 = vector.broadcast %312 : f32 to vector<1x256xf32>
    %314 = arith.mulf %313, %7 : vector<1x256xf32>
    %315 = arith.addf %311, %314 : vector<1x256xf32>
    %c7_158 = arith.constant 7 : index
    %c0_159 = arith.constant 0 : index
    %316 = memref.load %arg5[%c7_158, %c0_159] : memref<8x4xf32, #tpu.memory_space<smem>>
    %317 = vector.broadcast %316 : f32 to vector<1x256xf32>
    %318 = arith.mulf %317, %9 : vector<1x256xf32>
    %319 = arith.addf %315, %318 : vector<1x256xf32>
    %c7_160 = arith.constant 7 : index
    %c1_161 = arith.constant 1 : index
    %320 = memref.load %arg5[%c7_160, %c1_161] : memref<8x4xf32, #tpu.memory_space<smem>>
    %321 = vector.broadcast %320 : f32 to vector<1x256xf32>
    %322 = arith.mulf %321, %11 : vector<1x256xf32>
    %323 = arith.addf %319, %322 : vector<1x256xf32>
    %c7_162 = arith.constant 7 : index
    %c2_163 = arith.constant 2 : index
    %324 = memref.load %arg5[%c7_162, %c2_163] : memref<8x4xf32, #tpu.memory_space<smem>>
    %325 = vector.broadcast %324 : f32 to vector<1x256xf32>
    %326 = arith.mulf %325, %13 : vector<1x256xf32>
    %327 = arith.addf %323, %326 : vector<1x256xf32>
    %c7_164 = arith.constant 7 : index
    %c3_165 = arith.constant 3 : index
    %328 = memref.load %arg5[%c7_164, %c3_165] : memref<8x4xf32, #tpu.memory_space<smem>>
    %329 = vector.broadcast %328 : f32 to vector<1x256xf32>
    %330 = arith.mulf %329, %15 : vector<1x256xf32>
    %331 = arith.addf %327, %330 : vector<1x256xf32>
    %c7_166 = arith.constant 7 : index
    %332 = memref.load %arg7[%c7_166] : memref<8xf32, #tpu.memory_space<smem>>
    %cst_167 = arith.constant 0.000000e+00 : f32
    %333 = vector.broadcast %cst_167 : f32 to vector<1x256xf32>
    %334 = arith.maximumf %331, %333 : vector<1x256xf32>
    %335 = vector.broadcast %332 : f32 to vector<1x256xf32>
    %336 = arith.mulf %335, %334 : vector<1x256xf32>
    %337 = arith.addf %297, %336 : vector<1x256xf32>
    %338 = arith.negf %337 : vector<1x256xf32>
    %339 = math.exp %338 : vector<1x256xf32>
    %cst_168 = arith.constant 1.000000e+00 : f32
    %340 = vector.broadcast %cst_168 : f32 to vector<1x256xf32>
    %341 = arith.addf %340, %339 : vector<1x256xf32>
    %342 = arith.divf %340, %341 : vector<1x256xf32>
    %c0_169 = arith.constant 0 : index
    %c0_170 = arith.constant 0 : index
    %c0_171 = arith.constant 0 : index
    %343 = vector.load %arg3[%c0_169, %c0_170, %c0_171] : memref<1x4x256xf32, #tpu.memory_space<vmem>>, vector<1x4x256xf32>
    %344 = vector.shape_cast %343 : vector<1x4x256xf32> to vector<4x256xf32>
    %345 = vector.broadcast %342 : vector<1x256xf32> to vector<4x256xf32>
    %346 = arith.mulf %344, %345 : vector<4x256xf32>
    %c0_172 = arith.constant 0 : index
    %c0_173 = arith.constant 0 : index
    %c0_174 = arith.constant 0 : index
    %347 = vector.load %arg9[%c0_172, %c0_173, %c0_174] : memref<1x4x256xf32, #tpu.memory_space<vmem>>, vector<1x4x256xf32>
    %348 = vector.shape_cast %347 : vector<1x4x256xf32> to vector<4x256xf32>
    %349 = vector.shape_cast %346 : vector<4x256xf32> to vector<1x4x256xf32>
    tpu.vector_store %arg9[%c0_172, %c0_173, %c0_174], %349 {strides = array<i32>} : memref<1x4x256xf32, #tpu.memory_space<vmem>>, vector<1x4x256xf32>,
    return
  }
  func.func @transform_0(%arg0: i32, %arg1: i32) -> (i32, i32, i32) {
    %c0_i32 = arith.constant 0 : i32
    %c0_i32_0 = arith.constant 0 : i32
    return %arg0, %c0_i32, %arg1 : i32, i32, i32
  }
  func.func @transform_1(%arg0: i32, %arg1: i32) -> (i32, i32, i32) {
    %c0_i32 = arith.constant 0 : i32
    %c0_i32_0 = arith.constant 0 : i32
    return %arg0, %c0_i32, %arg1 : i32, i32, i32
  }
  func.func @transform_2(%arg0: i32, %arg1: i32) -> (i32, i32) {
    %c0_i32 = arith.constant 0 : i32
    %c0_i32_0 = arith.constant 0 : i32
    %c0_i32_1 = arith.constant 0 : i32
    return %c0_i32, %c0_i32_0 : i32, i32
  }
  func.func @transform_3(%arg0: i32, %arg1: i32) -> (i32, i32) {
    %c0_i32 = arith.constant 0 : i32
    %c0_i32_0 = arith.constant 0 : i32
    %c0_i32_1 = arith.constant 0 : i32
    return %c0_i32, %c0_i32_0 : i32, i32
  }
  func.func @transform_4(%arg0: i32, %arg1: i32) -> i32 {
    %c0_i32 = arith.constant 0 : i32
    %c0_i32_0 = arith.constant 0 : i32
    return %c0_i32 : i32
  }
  func.func @transform_5(%arg0: i32, %arg1: i32) -> i32 {
    %c0_i32 = arith.constant 0 : i32
    %c0_i32_0 = arith.constant 0 : i32
    return %c0_i32 : i32
  }
  func.func @transform_6(%arg0: i32, %arg1: i32) -> i32 {
    %c0_i32 = arith.constant 0 : i32
    %c0_i32_0 = arith.constant 0 : i32
    return %c0_i32 : i32
  }
  func.func @transform_7(%arg0: i32, %arg1: i32) -> (i32, i32, i32) {
    %c0_i32 = arith.constant 0 : i32
    %c0_i32_0 = arith.constant 0 : i32
    return %arg0, %c0_i32, %arg1 : i32, i32, i32
  }
}

</mosaic_0001>

<bundles_post_ra>
// kernel: tpu_custom_call.1
= control target key start
LH: loop header
LB: loop body
LE: loop exit
PB: predicated region body
PF: predicated region fallthrough
CT: control target
= control target key end

     0   :  { %s1869_s0 = inlined_call_operand.vmem [shape: f32[2,4,256], index: 0, kind: input, shape index: {}]   ;;  %s1870_s1 = inlined_call_operand.hbm [shape: f32[2,4,256], index: 1, kind: input, shape index: {}]   ;;  %s1871_s2 = inlined_call_operand.vmem [shape: f32[8,4], index: 2, kind: input, shape index: {}]   ;;  %s1872_s3 = inlined_call_operand.vmem [shape: f32[8,4], index: 3, kind: input, shape index: {}]   ;;  %s1873_s4 = inlined_call_operand.vmem [shape: f32[8], index: 4, kind: input, shape index: {}]   ;;  %s1874_s5 = inlined_call_operand.vmem [shape: f32[8], index: 5, kind: input, shape index: {}]   ;;  %s1875_s6 = inlined_call_operand.<no memory space> [shape: f32[1], index: 6, kind: input, shape index: {}]   ;;  %s1876_s7 = inlined_call_operand.hbm [shape: f32[2,4,256], index: 7, kind: output, shape index: {}]  }
   0x1   :  { %1885 = sst [smem:[#allocation24_spill]] %s1869_s0 }
   0x2   :  { %1886 = sst [smem:[#allocation25_spill]] %s1870_s1 }
   0x3   :  { %1887 = sst [smem:[#allocation26_spill]] %s1871_s2 }
   0x4   :  { %1888 = sst [smem:[#allocation27_spill]] %s1872_s3 }
   0x5   :  { %1889 = sst [smem:[#allocation28_spill]] %s1873_s4 }
   0x6   :  { %1890 = sst [smem:[#allocation29_spill]] %s1874_s5 }
   0x7   :  { %12 = sst [smem:[#allocation2]] %s1875_s6 }
   0x8   :  { %13 = vsyncpa [#allocation4], 0 }
   0x9   :  { %15 = vsyncpa [#allocation4 + $0x1], 0 }
   0xa   :  { %16 = vsyncpa [#allocation6], 0 }
   0xb   :  { %17 = vsyncpa [#allocation9], 0 }
   0xc   :  { %18 = vsyncpa [#allocation12], 0 }
   0xd   :  { %19 = vsyncpa [#allocation5], 0 }
   0xe   :  { %21 = vsyncpa [#allocation5 + $0x1], 0  ;;  %s1361_s26 = smov 0   ;;  %s1363_s27 = smov 0  }
   0xf   :  { %s1365_s28 = smov 0   ;;  %s1367_s29 = smov 0  }
  0x10   :  { %s1369_s30 = smov 0   ;;  %s1371_s8 = smov 0  }
  0x11 LB: > { %1891 = sst [smem:[#allocation19_spill]] %s1294_s27  ;;  %s912_s11 = sadd.s32 4294967295, %s1310_s8   ;;  %s1310_s8 = sphi %s1371_s8, %s27_s8   ;;  %s1306_s30 = sphi %s1369_s30, %s1919_s30   ;;  %s1302_s29 = sphi %s1367_s29, %s1918_s29   ;;  %s1298_s28 = sphi %s1365_s28, %s1917_s28   ;;  %s1294_s27 = sphi %s1363_s27, %s1916_s27   ;;  %s1290_s26 = sphi %s1361_s26, %s1915_s26  }
  0x12   : > { %1892 = sst [smem:[#allocation20_spill]] %s1298_s28  ;;  %p914_p0 = scmp.ge.s32.totalorder %s1310_s8, 1 }
  0x13   : > { %1893 = sst [smem:[#allocation21_spill]] %s1306_s30  ;;  %p1398_p1 = scmp.eq.s32.totalorder %s912_s11, 0 }
  0x14   : > { %s1894_s3 = sld [smem:[#allocation27_spill]]  ;;  %p233_p2 = scmp.lt.s32.totalorder %s1310_s8, 3 }
  0x15   : > { %s1895_s12 = scalar_select %p1398_p1, 1, 0 }
  0x16   : > { %p1403_p3 = pnand %p914_p0, %p233_p2  ;;  %s1897_s2 = sld [smem:[#allocation26_spill]] }
  0x17   : > { %s1899_s4 = sld [smem:[#allocation28_spill]] }
  0x18   : > { %s1896_s13 = scalar_select %p1403_p3, 1, 0 }
  0x19   : > { %p1043_p5 = pneg %p1403_p3  ;;  %s1900_s5 = sld [smem:[#allocation29_spill]] }
  0x1a   : > { %s257_s10 = sshll.u32 %s1894_s3, 4  ;;  %s258_s10 = int_to_ptr.vmem [resolvable:$true] %s257_s10 }
  0x1b   : > { %p1415_p6 = pnand %p1043_p5, %p1398_p1  ;;  %s1130_s24 = scalar_lea.vmem %s258_s10, 128 }
  0x1c   : > { %s246_s16 = sshll.u32 %s1897_s2, 4  ;;  %p1131_p7 = scmp.ne.s32.totalorder %s258_s10, %s1130_s24  ;;  %s247_s16 = int_to_ptr.vmem [resolvable:$true] %s246_s16 }
  0x1d   : > { %s268_s20 = sshll.u32 %s1899_s4, 4  ;;  %p1132_p8 = pneg %p1415_p6  ;;  %s1422_s20 = int_to_ptr.vmem [resolvable:$true] %s268_s20 }
  0x1e   : > { %p1138_p11 = scmp.lt.s32.totalorder %s258_s10, %s258_s10  ;;  %p1139_p12 = scmp.lt.s32.totalorder %s1130_s24, %s1130_s24 }
  0x1f   : > { %s279_s23 = sshll.u32 %s1900_s5, 4  ;;  %p1133_p9 = pnand %p1132_p8, %p1131_p7  ;;  %s280_s23 = int_to_ptr.vmem [resolvable:$true] %s279_s23 }
  0x20   : > { %p1140_p13 = por %p1139_p12, %p1138_p11 }
  0x21   : > { %p1134_p10 = pneg %p1133_p9 }
  0x23   : > { %p1141_p0 = pnand %p1140_p13, %p1134_p10 }
  0x25   : > { %1144 = shalt.err (!%p1141_p0)
}
  0x26   : > { %s1312_s25 = smov [#allocation8]   ;;  %s1145_s6 = scalar_lea.vmem %s247_s16, 128 }
  0x27   : > { %1049 = dma.vmem_to_smem (!%p1415_p6), %s258_s10, 128, %s1312_s25, [#allocation9]  }
  0x28   : > { %p1146_p2 = scmp.ne.s32.totalorder %s247_s16, %s1145_s6  ;;  %p1153_p3 = scmp.lt.s32.totalorder %s247_s16, %s247_s16 }
  0x29   : > { %p1154_p1 = scmp.lt.s32.totalorder %s1145_s6, %s1145_s6 }
  0x2a   : > { %p1148_p5 = pnand %p1146_p2, %p1132_p8 }
  0x2b   : > { %p1155_p7 = por %p1154_p1, %p1153_p3 }
  0x2c   : > { %p1149_p4 = pneg %p1148_p5 }
  0x2e   : > { %p1156_p9 = pnand %p1155_p7, %p1149_p4 }
  0x30   : > { %1159 = shalt.err (!%p1156_p9)
}
  0x31   : > { %s1313_s9 = smov [#allocation7]   ;;  %s1160_s10 = scalar_lea.vmem %s1422_s20, 16 }
  0x32   : > { %1046 = dma.vmem_to_smem (!%p1415_p6), %s247_s16, 128, %s1313_s9, [#allocation6]  }
  0x33   : > { %p1161_p10 = scmp.ne.s32.totalorder %s1422_s20, %s1160_s10  ;;  %p1168_p13 = scmp.lt.s32.totalorder %s1422_s20, %s1422_s20 }
  0x34   : > { %p1169_p0 = scmp.lt.s32.totalorder %s1160_s10, %s1160_s10 }
  0x35   : > { %p1163_p11 = pnand %p1161_p10, %p1132_p8 }
  0x36   : > { %p1170_p1 = por %p1169_p0, %p1168_p13 }
  0x37   : > { %p1164_p12 = pneg %p1163_p11 }
  0x39   : > { %p1171_p3 = pnand %p1170_p1, %p1164_p12 }
  0x3b   : > { %1174 = shalt.err (!%p1171_p3)
}
  0x3c   : > { %s1314_s14 = smov [#allocation10]   ;;  %s1175_s18 = scalar_lea.vmem %s280_s23, 16 }
  0x3d   : > { %1052 = dma.vmem_to_smem (!%p1415_p6), %s1422_s20, 16, %s1314_s14, [#allocation9]  }
  0x3e   : > { %p1176_p4 = scmp.ne.s32.totalorder %s280_s23, %s1175_s18  ;;  %p1183_p7 = scmp.lt.s32.totalorder %s280_s23, %s280_s23 }
  0x3f   : > { %p1184_p9 = scmp.lt.s32.totalorder %s1175_s18, %s1175_s18 }
  0x40   : > { %p1178_p2 = pnand %p1176_p4, %p1132_p8 }
  0x41   : > { %p1185_p10 = por %p1184_p9, %p1183_p7 }
  0x42   : > { %p1179_p5 = pneg %p1178_p2 }
  0x44   : > { %p1186_p11 = pnand %p1185_p10, %p1179_p5 }
  0x46   : > { %1189 = shalt.err (!%p1186_p11)
}
  0x47   : > { %s1315_s19 = smov [#allocation11]   ;;  %s913_s20 = sadd.s32 4294967294, %s1310_s8  }
  0x48   : > { %1055 = dma.vmem_to_smem (!%p1415_p6), %s280_s23, 16, %s1315_s19, [#allocation12]  }
  0x49   : > { %s39_s21 = sadd.s32 1, %s1306_s30  ;;  %s76_s22 = sadd.s32 1, %s1298_s28 }
  0x4a   : > { %p41_p8 = scmp.ge.s32.totalorder %s39_s21, 2  ;;  %p83_p12 = scmp.ne.s32.totalorder %s1298_s28, %s1294_s27 }
  0x4b   : > { %p84_p13 = scmp.eq.s32.totalorder %s1310_s8, 0  ;;  %p89_p1 = scmp.ne.s32.totalorder %s1294_s27, %s1290_s26 }
  0x4c   : > { %s1921_s21 = smov (%p41_p8, %s39_s21), 0  ;;  %p220_p6 = scmp.eq.s32.totalorder %s912_s11, 1 }
  0x4d   : > { %1901 = sst [smem:[#allocation22_spill]] %s1921_s21  ;;  %p1466_p0 = por %p84_p13, %p83_p12 }
  0x4e   : > { %s71_s23 = ssub.s32 %s1306_s30, %s1921_s21  ;;  %p1903_p4 = scmp.ne.s32.totalorder %s1895_s12, 0 }
  0x4f   : > { %p74_p3 = scmp.eq.s32.totalorder %s71_s23, 0  ;;  %p1482_p5 = por %p220_p6, %p83_p12 }
  0x50   : > { %p1478_p2 = por %p1903_p4, %p89_p1  ;;  %p226_p7 = scmp.eq.s32.totalorder %s913_s20, 1 }
  0x51   : > { %s1487_s6 = scalar_select %p74_p3, %s1298_s28, %s76_s22  }
  0x52   : > { %p1489_p9 = por %p226_p7, %p89_p1  ;;  %p1068_p10 = scmp.lt.s32.totalorder %s1310_s8, 2 }
  0x53   : > { %1906 = sst [smem:[#allocation23_spill]] %s1487_s6  ;;  %s306_s10 = sand.u32 1, %s1298_s28  }
  0x54   : > { %s1020_s11 = sshll.u32 %s1306_s30, 7  ;;  %s920_s14 = sshll.u32 %s306_s10, 3 }
  0x55   : > { %s1908_s1 = sld [smem:[#allocation25_spill]]  ;;  %s310_s19 = scalar_lea.vmem [#allocation3], %s920_s14 }
  0x56   : > { %s320_s23 = sshll.u32 %s310_s19, 4  ;;  %p1501_p11 = pnand %p1068_p10, %p1466_p0  ;;  %s321_s23 = int_to_ptr.vmem [resolvable:$true] %s320_s23 }
  0x57   : > { %s307_s20 = scalar_lea.sflag [#allocation4], %s306_s10  ;;  %s1203_s22 = scalar_lea.vmem %s321_s23, 128 }
  0x58   : > { %p1192_p8 = pneg %p1501_p11  ;;  %p1204_p12 = scmp.ne.s32.totalorder %s321_s23, %s1203_s22 }
  0x59   : > { %s1316_s3 = smov [#allocation3]  }
  0x5a   : > { %p1206_p13 = pnand %p1204_p12, %p1192_p8  ;;  %s1208_s4 = sshll.u32 %s1316_s3, 4  ;;  %s1209_s4 = int_to_ptr.vmem [resolvable:$false] %s1208_s4 }
  0x5b   : > { %s318_s18 = scalar_lea.hbm %s1908_s1, %s1020_s11  ;;  %s1210_s11 = scalar_lea.vmem %s1209_s4, 256 }
  0x5c   : > { %p1207_p1 = pneg %p1206_p13  ;;  %p1211_p6 = scmp.lt.s32.totalorder %s321_s23, %s1209_s4 }
  0x5d   : > { %p1212_p3 = scmp.lt.s32.totalorder %s1210_s11, %s1203_s22 }
  0x5f   : > { %p1213_p4 = por %p1212_p3, %p1211_p6 }
  0x61   : > { %p1214_p0 = pnand %p1213_p4, %p1207_p1 }
  0x63   : > { %1217 = shalt.err (!%p1214_p0)
}
  0x64   : > { %1059 = dma.hbm_to_vmem [thread:$0]  (!%p1501_p11), %s318_s18, 128, %s321_s23, %s307_s20  }
  0x65   : > { %p1910_p7 = scmp.ne.s32.totalorder %s1896_s13, 0 }
  0x66   : > { %s1512_s17 = sand.u32 (!%p1910_p7), 1, %s1294_s27  }
  0x67   : > { %329 = sbr.rel (%p1910_p7) target bundleno = 273 (0x111), region = 48  ;;  %s1880_s3 = sshll.u32 (!%p1910_p7), %s1512_s17, 3 }
  0x68   : > { %s332_s10 = scalar_lea.sflag (!%p1910_p7), [#allocation4], %s1512_s17  ;;  %s1518_s4 = scalar_lea.vmem (!%p1910_p7), [#allocation3], %s1880_s3 }
  0x6c   : > { %1269 = dma.done.wait (%p1478_p2), %s332_s10, 128  }
  0x6d   : > { %1271 = vsyncadd (%p1478_p2), %s332_s10, 4294967168  ;;  %p1911_p10 = scmp.ne.s32.totalorder %s1895_s12, 0 }
  0x6f   : > { %1273 = dma.done.wait (%p1911_p10), [#allocation6], 128  }
  0x70   : > { %1275 = vsyncadd (%p1911_p10), [#allocation6], 4294967168 }
  0x71   : > { %1277 = dma.done.wait (%p1911_p10), [#allocation9], 144  }
  0x72   : > { %1279 = vsyncadd (%p1911_p10), [#allocation9], 4294967152 }
  0x73   : > { %1281 = dma.done.wait (%p1911_p10), [#allocation12], 16  }
  0x74   : > { %1283 = vsyncadd (%p1911_p10), [#allocation12], 4294967280 }
  0x75   : > { %356 = sfence }
  0x76   : > { %p393_p2 = scmp.lt.s32.totalorder %s1302_s29, 1  ;;  %s1538_s13 = sld [smem:[#allocation2]]  ;;  %v1603_v20 = vld [vmem:[%s1518_s4] ss:$4 sm:$0x3] }
  0x77   : > { %s420_s24 = sld [smem:[#allocation10]]  ;;  %v1621_v31 = vld [vmem:[%s1518_s4 + $0x1] ss:$4 sm:$0x3] }
  0x78   : > { %s394_s2 = scalar_select %p393_p2, %s1302_s29, 1  ;;  %v1633_v39 = vld [vmem:[%s1518_s4 + $0x2] ss:$4 sm:$0x3] }
  0x79   : > { %s422_s14 = sld [smem:[#allocation7]]  ;;  %v1656_v55 = vld [vmem:[%s1518_s4 + $0x3] ss:$4 sm:$0x3] }
  0x7a   : > { %s938_s15 = sld [smem:[#allocation7 + $0x1]]  ;;  %s1021_s18 = sshll.u32 %s394_s2, 3 }
  0x7b   : > { %s1540_s16 = sld [smem:[#allocation7 + $0x2]] }
  0x7c   : > { %s1542_s19 = sld [smem:[#allocation7 + $0x3]] }
  0x7d   : > { %s1544_s23 = sld [smem:[#allocation8]]  ;;  %v421_v4 = vstv %s420_s24 }
  0x7e   : > { %s1546_s20 = sld [smem:[#allocation8 + $0x1]] }
  0x7f   : > { %s1912_s0 = sld [smem:[#allocation24_spill]]  ;;  %v423_v1 = vstv %s422_s14 }
  0x80   : > { %s1551_s10 = sld [smem:[#allocation8 + $0x2]]  ;;  %v427_v5 = vstv %s938_s15 }
  0x81   : > { %s1553_s3 = sld [smem:[#allocation8 + $0x3]]  ;;  %v431_v9 = vstv %s1540_s16 }
  0x82   : > { %s1555_s1 = sld [smem:[#allocation11]]  ;;  %v435_v14 = vstv %s1542_s19 }
  0x83   : > { %s1559_s2 = sld [smem:[#allocation10 + $0x1]]  ;;  %v439_v21 = vstv %s1544_s23 }
  0x84   : > { %s945_s5 = sld [smem:[#allocation7 + $0x80]]  ;;  %v440_v30 = vmul.f32 %v439_v21, %v1603_v20  ;;  %v443_v32 = vstv %s1546_s20 }
  0x85   : > { %s400_s11 = scalar_lea.vmem %s1912_s0, %s1021_s18  ;;  %s1561_s21 = sld [smem:[#allocation7 + $0x81]]  ;;  %v444_v41 = vmul.f32 %v1621_v31, %v443_v32 }
  0x86   : > { %v1557_v0 = vld [vmem:[%s400_s11] ss:$4 sm:$0x3]  ;;  %s1564_s30 = sld [smem:[#allocation7 + $0x82]]  ;;  %v447_v42 = vstv %s1551_s10 }
  0x87   : > { %v424_v2 = vmul.f32 %v423_v1, %v1557_v0  ;;  %v1566_v3 = vld [vmem:[%s400_s11 + $0x1] ss:$4 sm:$0x3]  ;;  %s1568_s18 = sld [smem:[#allocation7 + $0x83]]  ;;  %v448_v48 = vmul.f32 %v1633_v39, %v447_v42  ;;  %v451_v56 = vstv %s1553_s3 }
  0x88   : > { %s1570_s12 = sld [smem:[#allocation8 + $0x80]]  ;;  %v428_v7 = vmul.f32 %v1566_v3, %v427_v5  ;;  %v1577_v8 = vld [vmem:[%s400_s11 + $0x2] ss:$4 sm:$0x3] }
  0x89   : > { %s1572_s14 = sld [smem:[#allocation8 + $0x81]]  ;;  %v425_v6 = vadd.f32 %v424_v2, %v421_v4  ;;  %v432_v12 = vmul.f32 %v1577_v8, %v431_v9  ;;  %v1587_v13 = vld [vmem:[%s400_s11 + $0x3] ss:$4 sm:$0x3]  ;;  %v460_v16 = vstv %s1559_s2  ;;  %v452_v4 = vmul.f32 %v1656_v55, %v451_v56 }
  0x8a   : > { %s1575_s22 = sld [smem:[#allocation8 + $0x82]]  ;;  %v462_v10 = vstv %s945_s5  ;;  %v436_v19 = vmul.f32 %v1587_v13, %v435_v14 }
  0x8b   : > { %s1580_s0 = sld [smem:[#allocation8 + $0x83]]  ;;  %v429_v11 = vadd.f32 %v428_v7, %v425_v6  ;;  %v463_v15 = vmul.f32 %v462_v10, %v1557_v0  ;;  %v466_v17 = vstv %s1561_s21 }
  0x8c   : > { %s1582_s24 = sld [smem:[#allocation10 + $0x2]]  ;;  %v467_v23 = vmul.f32 %v1566_v3, %v466_v17  ;;  %v470_v25 = vstv %s1564_s30 }
  0x8d   : > { %s955_s15 = sld [smem:[#allocation7 + $0x100]]  ;;  %v433_v18 = vadd.f32 %v432_v12, %v429_v11  ;;  %v464_v22 = vadd.f32 %v463_v15, %v460_v16  ;;  %v471_v34 = vmul.f32 %v1577_v8, %v470_v25  ;;  %v474_v35 = vstv %s1568_s18 }
  0x8e   : > { %s1585_s6 = sld [smem:[#allocation7 + $0x101]]  ;;  %v475_v44 = vmul.f32 %v1587_v13, %v474_v35  ;;  %v478_v45 = vstv %s1570_s12 }
  0x8f   : > { %s1591_s16 = sld [smem:[#allocation11 + $0x1]]  ;;  %v437_v29 = vadd.f32 %v436_v19, %v433_v18  ;;  %v468_v33 = vadd.f32 %v467_v23, %v464_v22  ;;  %v479_v58 = vmul.f32 %v478_v45, %v1603_v20  ;;  %v482_v59 = vstv %s1572_s14 }
  0x90   : > { %s1595_s5 = sld [smem:[#allocation7 + $0x102]]  ;;  %v483_v7 = vmul.f32 %v1621_v31, %v482_v59  ;;  %v486_v9 = vstv %s1575_s22  ;;  %v456_v45 = vstv %s1555_s1 }
  0x91   : > { %s1597_s28 = sld [smem:[#allocation7 + $0x103]]  ;;  %v441_v40 = vadd.f32 %v440_v30, %v437_v29  ;;  %v472_v43 = vadd.f32 %v471_v34, %v468_v33  ;;  %v487_v17 = vmul.f32 %v1633_v39, %v486_v9  ;;  %v490_v18 = vstv %s1580_s0 }
  0x92   : > { %s1600_s27 = sld [smem:[#allocation8 + $0x100]]  ;;  %v499_v27 = vstv %s1582_s24 }
  0x93   : > { %v501_v24 = vstv %s955_s15  ;;  %s1607_s21 = sld [smem:[#allocation8 + $0x101]]  ;;  %v445_v51 = vadd.f32 %v444_v41, %v441_v40  ;;  %v476_v57 = vadd.f32 %v475_v44, %v472_v43 }
  0x94   : > { %v502_v26 = vmul.f32 %v501_v24, %v1557_v0  ;;  %s1611_s19 = sld [smem:[#allocation8 + $0x102]]  ;;  %v505_v28 = vstv %s1585_s6 }
  0x95   : > { %s1615_s11 = sld [smem:[#allocation8 + $0x103]]  ;;  %v506_v37 = vmul.f32 %v1566_v3, %v505_v28  ;;  %v449_v2 = vadd.f32 %v448_v48, %v445_v51  ;;  %v480_v6 = vadd.f32 %v479_v58, %v476_v57 }
  0x96   : > { %s1618_s23 = sld [smem:[#allocation10 + $0x3]]  ;;  %v503_v36 = vadd.f32 %v502_v26, %v499_v27  ;;  %v509_v38 = vstv %s1595_s5 }
  0x97   : > { %s965_s30 = sld [smem:[#allocation7 + $0x180]]  ;;  %v510_v47 = vmul.f32 %v1577_v8, %v509_v38  ;;  %v513_v49 = vstv %s1597_s28  ;;  %v453_v16 = vadd.f32 %v452_v4, %v449_v2  ;;  %v484_v21 = vadd.f32 %v483_v7, %v480_v6 }
  0x98   : > { %s1627_s6 = sld [smem:[#allocation7 + $0x181]]  ;;  %v507_v46 = vadd.f32 %v506_v37, %v503_v36  ;;  %v514_v61 = vmul.f32 %v1587_v13, %v513_v49  ;;  %v517_v62 = vstv %s1600_s27  ;;  %v491_v38 = vmul.f32 %v1656_v55, %v490_v18 }
  0x99   : > { %s1630_s2 = sld [smem:[#allocation11 + $0x2]]  ;;  %v518_v11 = vmul.f32 %v517_v62, %v1603_v20  ;;  %v521_v12 = vstv %s1607_s21  ;;  %v488_v37 = vadd.f32 %v487_v17, %v484_v21  ;;  %v455_v41 = vmax.f32 %v453_v16, 0.0 }
  0x9a   : > { %s1637_s20 = sld [smem:[#allocation7 + $0x182]]  ;;  %v511_v60 = vadd.f32 %v510_v47, %v507_v46  ;;  %v522_v22 = vmul.f32 %v1621_v31, %v521_v12  ;;  %v525_v26 = vstv %s1611_s19 }
  0x9b   : > { %s1640_s18 = sld [smem:[#allocation7 + $0x183]]  ;;  %v526_v43 = vmul.f32 %v1633_v39, %v525_v26  ;;  %v529_v46 = vstv %s1615_s11  ;;  %v457_v57 = vmul.f32 %v456_v45, %v455_v41 }
  0x9c   : > { %s1644_s24 = sld [smem:[#allocation8 + $0x180]]  ;;  %v538_v52 = vstv %s1618_s23  ;;  %v515_v10 = vadd.f32 %v514_v61, %v511_v60  ;;  %v530_v59 = vmul.f32 %v1656_v55, %v529_v46 }
  0x9d   : > { %v540_v50 = vstv %s965_s30  ;;  %s1648_s10 = sld [smem:[#allocation8 + $0x181]] }
  0x9e   : > { %v541_v53 = vmul.f32 %v540_v50, %v1557_v0  ;;  %v544_v54 = vstv %s1627_s6  ;;  %s1653_s15 = sld [smem:[#allocation8 + $0x182]]  ;;  %v519_v25 = vadd.f32 %v518_v11, %v515_v10 }
  0x9f   : > { %s1660_s28 = sld [smem:[#allocation8 + $0x183]]  ;;  %v545_v1 = vmul.f32 %v1566_v3, %v544_v54  ;;  %v495_v54 = vstv %s1591_s16 }
  0xa0   : > { %s1664_s12 = sld [smem:[#allocation10 + $0x4]]  ;;  %v542_v63 = vadd.f32 %v541_v53, %v538_v52  ;;  %v548_v5 = vstv %s1637_s20  ;;  %v523_v42 = vadd.f32 %v522_v22, %v519_v25  ;;  %v419_v52 = vstv %s1538_s13 }
  0xa1   : > { %s975_s5 = sld [smem:[#allocation7 + $0x200]]  ;;  %v549_v15 = vmul.f32 %v1577_v8, %v548_v5  ;;  %v552_v19 = vstv %s1640_s18  ;;  %v492_v53 = vadd.f32 %v491_v38, %v488_v37 }
  0xa2   : > { %s976_s3 = sld [smem:[#allocation7 + $0x201]]  ;;  %v546_v14 = vadd.f32 %v545_v1, %v542_v63  ;;  %v553_v30 = vmul.f32 %v1587_v13, %v552_v19  ;;  %v556_v34 = vstv %s1644_s24  ;;  %v527_v58 = vadd.f32 %v526_v43, %v523_v42 }
  0xa3   : > { %s977_s14 = sld [smem:[#allocation7 + $0x202]]  ;;  %v557_v48 = vmul.f32 %v556_v34, %v1603_v20  ;;  %v560_v49 = vstv %s1648_s10  ;;  %v494_v7 = vmax.f32 %v492_v53, 0.0 }
  0xa4   : > { %s1674_s27 = sld [smem:[#allocation7 + $0x203]]  ;;  %v550_v29 = vadd.f32 %v549_v15, %v546_v14  ;;  %v564_v60 = vstv %s1653_s15  ;;  %v561_v62 = vmul.f32 %v1621_v31, %v560_v49  ;;  %v531_v12 = vadd.f32 %v530_v59, %v527_v58 }
  0xa5   : > { %s1677_s23 = sld [smem:[#allocation11 + $0x3]]  ;;  %v565_v14 = vmul.f32 %v1633_v39, %v564_v60  ;;  %v568_v18 = vstv %s1660_s28 }
  0xa6   : > { %s1682_s22 = sld [smem:[#allocation8 + $0x200]]  ;;  %v577_v23 = vstv %s1664_s12  ;;  %v554_v47 = vadd.f32 %v553_v30, %v550_v29 }
  0xa7   : > { %v579_v24 = vstv %s975_s5  ;;  %s1686_s21 = sld [smem:[#allocation8 + $0x201]] }
  0xa8   : > { %v580_v27 = vmul.f32 %v579_v24, %v1557_v0  ;;  %v583_v28 = vstv %s976_s3  ;;  %s1690_s30 = sld [smem:[#allocation8 + $0x202]]  ;;  %v558_v61 = vadd.f32 %v557_v48, %v554_v47 }
  0xa9   : > { %v584_v32 = vmul.f32 %v1566_v3, %v583_v28  ;;  %v587_v33 = vstv %s977_s14  ;;  %s1694_s0 = sld [smem:[#allocation8 + $0x203]] }
  0xaa   : > { %v581_v35 = vadd.f32 %v580_v27, %v577_v23  ;;  %v588_v36 = vmul.f32 %v1577_v8, %v587_v33  ;;  %s1698_s19 = sld [smem:[#allocation10 + $0x5]]  ;;  %v591_v40 = vstv %s1674_s27  ;;  %v562_v17 = vadd.f32 %v561_v62, %v558_v61 }
  0xab   : > { %s1702_s6 = sld [smem:[#allocation7 + $0x280]]  ;;  %v592_v51 = vmul.f32 %v1587_v13, %v591_v40  ;;  %v458_v27 = vadd.f32 %v457_v57, %v419_v52  ;;  %v534_v33 = vstv %s1630_s2 }
  0xac   : > { %v585_v44 = vadd.f32 %v584_v32, %v581_v35  ;;  %s1705_s20 = sld [smem:[#allocation7 + $0x281]]  ;;  %v595_v56 = vstv %s1682_s22  ;;  %v496_v32 = vmul.f32 %v495_v54, %v494_v7  ;;  %v566_v34 = vadd.f32 %v565_v14, %v562_v17 }
  0xad   : > { %s1710_s18 = sld [smem:[#allocation7 + $0x282]]  ;;  %v596_v4 = vmul.f32 %v595_v56, %v1603_v20  ;;  %v599_v9 = vstv %s1686_s21  ;;  %v569_v35 = vmul.f32 %v1656_v55, %v568_v18 }
  0xae   : > { %v589_v50 = vadd.f32 %v588_v36, %v585_v44  ;;  %s1714_s24 = sld [smem:[#allocation7 + $0x283]]  ;;  %v600_v23 = vmul.f32 %v1621_v31, %v599_v9  ;;  %v603_v26 = vstv %s1690_s30  ;;  %v533_v36 = vmax.f32 %v531_v12, 0.0 }
  0xaf   : > { %s1719_s1 = sld [smem:[#allocation8 + $0x280]]  ;;  %v604_v38 = vmul.f32 %v1633_v39, %v603_v26  ;;  %v607_v41 = vstv %s1694_s0  ;;  %v497_v49 = vadd.f32 %v496_v32, %v458_v27 }
  0xb0   : > { %s1723_s11 = sld [smem:[#allocation8 + $0x281]]  ;;  %v616_v63 = vstv %s1698_s19  ;;  %v593_v2 = vadd.f32 %v592_v51, %v589_v50  ;;  %v570_v50 = vadd.f32 %v569_v35, %v566_v34  ;;  %v608_v54 = vmul.f32 %v1656_v55, %v607_v41 }
  0xb1   : > { %s1726_s10 = sld [smem:[#allocation11 + $0x4]]  ;;  %v618_v1 = vstv %s1702_s6  ;;  %v535_v62 = vmul.f32 %v534_v33, %v533_v36 }
  0xb2   : > { %v619_v5 = vmul.f32 %v618_v1, %v1557_v0  ;;  %v622_v6 = vstv %s1705_s20  ;;  %s1733_s13 = sld [smem:[#allocation8 + $0x282]]  ;;  %v597_v22 = vadd.f32 %v596_v4, %v593_v2  ;;  %v572_v4 = vmax.f32 %v570_v50, 0.0 }
  0xb3   : > { %v623_v10 = vmul.f32 %v1566_v3, %v622_v6  ;;  %v626_v11 = vstv %s1710_s18  ;;  %s1738_s16 = sld [smem:[#allocation8 + $0x283]]  ;;  %v573_v6 = vstv %s1677_s23 }
  0xb4   : > { %v620_v15 = vadd.f32 %v619_v5, %v616_v63  ;;  %v627_v16 = vmul.f32 %v1577_v8, %v626_v11  ;;  %s1742_s15 = sld [smem:[#allocation10 + $0x6]]  ;;  %v630_v19 = vstv %s1714_s24  ;;  %v601_v37 = vadd.f32 %v600_v23, %v597_v22 }
  0xb5   : > { %v634_v21 = vstv %s1719_s1  ;;  %s1747_s12 = sld [smem:[#allocation7 + $0x300]]  ;;  %v631_v25 = vmul.f32 %v1587_v13, %v630_v19  ;;  %v574_v19 = vmul.f32 %v573_v6, %v572_v4 }
  0xb6   : > { %v624_v24 = vadd.f32 %v623_v10, %v620_v15  ;;  %s996_s5 = sld [smem:[#allocation7 + $0x301]]  ;;  %v635_v29 = vmul.f32 %v634_v21, %v1603_v20  ;;  %v638_v30 = vstv %s1723_s11  ;;  %v605_v53 = vadd.f32 %v604_v38, %v601_v37 }
  0xb7   : > { %s1752_s3 = sld [smem:[#allocation7 + $0x302]]  ;;  %v639_v42 = vmul.f32 %v1621_v31, %v638_v30  ;;  %v536_v15 = vadd.f32 %v535_v62, %v497_v49 }
  0xb8   : > { %v628_v28 = vadd.f32 %v627_v16, %v624_v24  ;;  %s1756_s28 = sld [smem:[#allocation7 + $0x303]]  ;;  %v642_v46 = vstv %s1733_s13  ;;  %v609_v10 = vadd.f32 %v608_v54, %v605_v53  ;;  %v612_v16 = vstv %s1726_s10  ;;  %s1022_s13 = sshll.u32 %s1302_s29, 7 }
  0xb9   : > { %s1760_s14 = sld [smem:[#allocation8 + $0x300]]  ;;  %v643_v59 = vmul.f32 %v1633_v39, %v642_v46  ;;  %v646_v63 = vstv %s1738_s16  ;;  %s1913_s16 = sshll.u32 %s1512_s17, 3 }
  0xba   : > { %v632_v40 = vadd.f32 %v631_v25, %v628_v28  ;;  %s1763_s27 = sld [smem:[#allocation8 + $0x301]]  ;;  %v655_v43 = vstv %s1742_s15  ;;  %v647_v12 = vmul.f32 %v1656_v55, %v646_v63  ;;  %v611_v28 = vmax.f32 %v609_v10, 0.0  ;;  %s391_s15 = scalar_lea.vmem [#allocation13], %s1913_s16 }
  0xbb   : > { %v657_v44 = vstv %s1747_s12  ;;  %s1769_s22 = sld [smem:[#allocation8 + $0x302]]  ;;  %s769_s12 = sshll.u32 %s391_s15, 4  ;;  %s770_s12 = int_to_ptr.vmem [resolvable:$true] %s769_s12 }
  0xbc   : > { %v636_v45 = vadd.f32 %v635_v29, %v632_v40  ;;  %s1772_s2 = sld [smem:[#allocation11 + $0x5]]  ;;  %v658_v47 = vmul.f32 %v657_v44, %v1557_v0  ;;  %v661_v48 = vstv %s996_s5 }
  0xbd   : > { %v662_v51 = vmul.f32 %v1566_v3, %v661_v48  ;;  %v665_v52 = vstv %s1752_s3  ;;  %s1777_s21 = sld [smem:[#allocation8 + $0x303]] }
  0xbe   : > { %v659_v56 = vadd.f32 %v658_v47, %v655_v43  ;;  %v666_v57 = vmul.f32 %v1577_v8, %v665_v52  ;;  %s1781_s30 = sld [smem:[#allocation10 + $0x7]]  ;;  %v640_v58 = vadd.f32 %v639_v42, %v636_v45  ;;  %v669_v60 = vstv %s1756_s28  ;;  %s767_s28 = scalar_lea.hbm %s1876_s7, %s1022_s13 }
  0xbf   : > { %v673_v61 = vstv %s1760_s14  ;;  %s1005_s0 = sld [smem:[#allocation7 + $0x380]]  ;;  %v670_v2 = vmul.f32 %v1587_v13, %v669_v60  ;;  %v613_v42 = vmul.f32 %v612_v16, %v611_v28  ;;  %s753_s14 = scalar_lea.sflag [#allocation5], %s1512_s17 }
  0xc0   : > { %v663_v1 = vadd.f32 %v662_v51, %v659_v56  ;;  %s1006_s19 = sld [smem:[#allocation7 + $0x381]]  ;;  %v677_v5 = vstv %s1763_s27  ;;  %v674_v9 = vmul.f32 %v673_v61, %v1603_v20  ;;  %v644_v11 = vadd.f32 %v643_v59, %v640_v58  ;;  %s1218_s27 = scalar_lea.vmem %s770_s12, 128 }
  0xc1   : > { %s1789_s6 = sld [smem:[#allocation7 + $0x382]]  ;;  %v681_v14 = vstv %s1769_s22  ;;  %v678_v18 = vmul.f32 %v1621_v31, %v677_v5  ;;  %p1219_p11 = scmp.ne.s32.totalorder %s770_s12, %s1218_s27 }
  0xc2   : > { %v667_v7 = vadd.f32 %v666_v57, %v663_v1  ;;  %s1793_s20 = sld [smem:[#allocation7 + $0x383]]  ;;  %v682_v25 = vmul.f32 %v1633_v39, %v681_v14  ;;  %v648_v29 = vadd.f32 %v647_v12, %v644_v11  ;;  %v651_v48 = vstv %s1772_s2  ;;  %s1317_s22 = smov [#allocation13]  }
  0xc3   : > { %s1797_s18 = sld [smem:[#allocation8 + $0x380]]  ;;  %v685_v21 = vstv %s1777_s21  ;;  %p1220_p8 = pnand %p1219_p11, %p1482_p5 }
  0xc4   : > { %v671_v17 = vadd.f32 %v670_v2, %v667_v7  ;;  %s1801_s23 = sld [smem:[#allocation8 + $0x381]]  ;;  %v694_v22 = vstv %s1781_s30  ;;  %v686_v34 = vmul.f32 %v1656_v55, %v685_v21  ;;  %v650_v44 = vmax.f32 %v648_v29, 0.0 }
  0xc5   : > { %v696_v23 = vstv %s1005_s0  ;;  %s1805_s24 = sld [smem:[#allocation8 + $0x382]]  ;;  %v740_v7 = vlaneseq  ;;  %p1221_p12 = pneg %p1220_p8 }
  0xc6   : > { %v675_v24 = vadd.f32 %v674_v9, %v671_v17  ;;  %v697_v26 = vmul.f32 %v696_v23, %v1557_v0  ;;  %v700_v27 = vstv %s1006_s19  ;;  %s1811_s1 = sld [smem:[#allocation8 + $0x383]]  ;;  %v652_v53 = vmul.f32 %v651_v48, %v650_v44 }
  0xc7   : > { %v701_v30 = vmul.f32 %v1566_v3, %v700_v27  ;;  %v704_v32 = vstv %s1789_s6  ;;  %s1003_s11 = sld [smem:[#allocation11 + $0x6]]  ;;  %v575_v3 = vadd.f32 %v574_v19, %v536_v15  ;;  %v738_v15 = vld [vmem:[%s1518_s4] sm:$0xff]  ;;  %s1222_s4 = sshll.u32 %s1317_s22, 4  ;;  %s1223_s4 = int_to_ptr.vmem [resolvable:$false] %s1222_s4 }
  0xc8   : > { %v679_v33 = vadd.f32 %v678_v18, %v675_v24  ;;  %v698_v35 = vadd.f32 %v697_v26, %v694_v22  ;;  %v705_v36 = vmul.f32 %v1577_v8, %v704_v32  ;;  %v708_v37 = vstv %s1793_s20  ;;  %s1013_s10 = sld [smem:[#allocation11 + $0x7]]  ;;  %s1224_s29 = scalar_lea.vmem %s1223_s4, 256 }
  0xc9   : > { %v712_v0 = vstv %s1797_s18  ;;  %v709_v41 = vmul.f32 %v1587_v13, %v708_v37  ;;  %v614_v51 = vadd.f32 %v613_v42, %v575_v3  ;;  %p1225_p13 = scmp.lt.s32.totalorder %s770_s12, %s1223_s4  ;;  %p1226_p1 = scmp.lt.s32.totalorder %s1224_s29, %s1218_s27 }
  0xca   : > { %v683_v38 = vadd.f32 %v682_v25, %v679_v33  ;;  %v702_v40 = vadd.f32 %v701_v30, %v698_v35  ;;  %v716_v43 = vstv %s1801_s23  ;;  %v713_v47 = vmul.f32 %v712_v0, %v1603_v20 }
  0xcb   : > { %v720_v49 = vstv %s1805_s24  ;;  %v717_v8 = vmul.f32 %v1621_v31, %v716_v43  ;;  %v653_v60 = vadd.f32 %v652_v53, %v614_v51  ;;  %p1227_p6 = por %p1226_p1, %p1225_p13 }
  0xcc   : > { %v687_v45 = vadd.f32 %v686_v34, %v683_v38  ;;  %v706_v46 = vadd.f32 %v705_v36, %v702_v40  ;;  %v724_v52 = vstv %s1811_s1  ;;  %v721_v13 = vmul.f32 %v1633_v39, %v720_v49 }
  0xcd   : > { %v690_v57 = vstv %s1003_s11  ;;  %v725_v59 = vmul.f32 %v1656_v55, %v724_v52  ;;  %v741_v55 = vshrl.u32 %v740_v7, 7  ;;  %p1228_p3 = pnand %p1227_p6, %p1221_p12 }
  0xce   : > { %v710_v50 = vadd.f32 %v709_v41, %v706_v46  ;;  %v689_v54 = vmax.f32 %v687_v45, 0.0  ;;  %v729_v63 = vstv %s1013_s10 }
  0xcf   : > { %v742_v9 = vsub.s32 0, %v741_v55  ;;  %v746_v10 = vsub.s32 1, %v741_v55 }
  0xd0   : > { %v714_v56 = vadd.f32 %v713_v47, %v710_v50  ;;  %v691_v61 = vmul.f32 %v690_v57, %v689_v54 }
  0xd2   : > { %v718_v58 = vadd.f32 %v717_v8, %v714_v56  ;;  %v692_v1 = vadd.f32 %v691_v61, %v653_v60 }
  0xd4   : > { %v722_v20 = vadd.f32 %v721_v13, %v718_v58 }
  0xd6   : > { %v726_v62 = vadd.f32 %v725_v59, %v722_v20 }
  0xd8   : > { %v728_v31 = vmax.f32 %v726_v62, 0.0 }
  0xda   : > { %v730_v2 = vmul.f32 %v729_v63, %v728_v31 }
  0xdc   : > { %v731_v4 = vadd.f32 %v730_v2, %v692_v1 }
  0xde   : > { %v1014_v5 = vmul.f32 -1.442695, %v731_v4 }
  0xe0   : > { %1126 = vpow2.f32 %v1014_v5 }
  0xed   : > { %v1127_v6 = vpop.eup %1126 }
  0xee   : > { %v735_v39 = vadd.f32 1.0, %v1127_v6 }
  0xf0   : > { %1128 = vrcp.f32 %v735_v39 }
  0xfd   : > { %v1129_v11 = vpop.eup %1128 }
  0xfe   : > { %v743_v12 = vrot.slane %v1129_v11, %v742_v9  ;;  %v747_v14 = vrot.slane %v1129_v11, %v746_v10 }
 0x100   : > { %v748_v16 = vcombine.low %v743_v12, %v747_v14 }
 0x102   : > { %v750_v17 = vmul.f32 %v748_v16, %v738_v15 }
 0x104   : > { %751 = vst [vmem:[%s391_s15] sm:$0xff] %v750_v17 }
 0x105   : > { %1231 = shalt.err (!%p1228_p3)
}
 0x106   : > { %s1232_s2 = scalar_lea.hbm %s767_s28, 128  ;;  %s1236_s30 = scalar_lea.hbm %s1876_s7, 256 }
 0x107   : > { %p1233_p4 = scmp.ne.s32.totalorder %s767_s28, %s1232_s2  ;;  %p1237_p10 = scmp.lt.s32.totalorder %s767_s28, %s1876_s7 }
 0x108   : > { %p1238_p2 = scmp.lt.s32.totalorder %s1236_s30, %s1232_s2 }
 0x109   : > { %p1234_p0 = pnand %p1233_p4, %p1482_p5 }
 0x10a   : > { %p1239_p11 = por %p1238_p2, %p1237_p10 }
 0x10b   : > { %p1235_p7 = pneg %p1234_p0 }
 0x10d   : > { %p1240_p8 = pnand %p1239_p11, %p1235_p7 }
 0x10f   : > { %1243 = shalt.err (!%p1240_p8)
}
 0x110   : > { %1041 = dma.vmem_to_hbm [thread:$0]  (%p1482_p5), %s770_s12, 128, %s767_s28, %s753_s14  }
 0x111 PF: > { %s781_s6 = sand.u32 1, %s1290_s26   ;;  %p1914_p12 = scmp.ge.s32.totalorder %s1310_s8, 2 }
 0x112   : > { %s782_s20 = scalar_lea.sflag [#allocation5], %s781_s6 }
 0x113   : > { %p1061_p13 = pnand %p1914_p12, %p1489_p9 }
 0x115   : > { %p1062_p1 = pneg %p1061_p13 }
 0x117   : > { %1285 = dma.done.wait (%p1062_p1), %s782_s20, 128  }
 0x118   : > { %1287 = vsyncadd (%p1062_p1), %s782_s20, 4294967168  ;;  %s27_s8 = sadd.s32 1, %s1310_s8   ;;  %s1915_s26 = sld [smem:[#allocation19_spill]] }
 0x119   : > { %p24_p6 = scmp.ge.s32.totalorder %s27_s8, 4   ;;  %s1916_s27 = sld [smem:[#allocation20_spill]] }
 0x11a   : > { %s1917_s28 = sld [smem:[#allocation23_spill]] }
 0x11b   : > { %s1918_s29 = sld [smem:[#allocation21_spill]]  ;;  %26 = sbr.rel (!%p24_p6) target bundleno = 17 (0x11), region = 119 }
 0x11c   : > { %s1919_s30 = sld [smem:[#allocation22_spill]] }
 0x120   :  { %787 = vsyncpa [#allocation4], 1 }
 0x121   :  { %789 = vsyncpa [#allocation4 + $0x1], 1 }
 0x122   :  { %790 = vsyncpa [#allocation5], 1 }
 0x123   :  { %792 = vsyncpa [#allocation5 + $0x1], 1 }
 0x124   :  { %793 = vsyncpa [#allocation6], 1 }
 0x125   :  { %795 = vsyncpa [#allocation6 + $0x1], 1 }
 0x126   :  { %796 = vsyncpa [#allocation9], 1 }
 0x127   :  { %797 = vsyncpa [#allocation12], 1 }

</bundles_post_ra>
